<compile_context>
chip_gen: v7x
topology: tpu7x:2x2x1
jax: 0.10.0
libtpu: 0.0.40
codegen_flags: <defaults>
</compile_context>

<pallas_src>
import jax
import jax.numpy as jnp
from jax import lax
from jax.experimental import pallas as pl
from jax.experimental.pallas import tpu as pltpu


def _round_up(a, b):
    return (a + b - 1) // b * b


def _vmem_capacity_bytes():
    """Per-core VMEM capacity; conservative 64 MiB (v7x) fallback."""
    try:
        info = pltpu.get_tpu_info()
        cap = int(getattr(info, "vmem_capacity_bytes", 0) or 0)
        if cap > 0:
            return cap
    except Exception:
        pass
    return 64 * 1024 * 1024


# --------------------------------------------------------------- kernels ----

def _ff_kernel_resident(x_ref, w1_ref, b1_ref, w2_ref, b2_ref, o_ref):
    # x_ref:(tm,D)  w1_ref:(D,H)  b1_ref:(1,H) f32  w2_ref:(H,D)  b2_ref:(1,D) f32
    # Whole hidden dim resident in VMEM: single fused pass, no accumulator.
    h = lax.dot_general(
        x_ref[...], w1_ref[...],
        dimension_numbers=(((1,), (0,)), ((), ())),
        preferred_element_type=jnp.float32)
    h = jnp.maximum(h + b1_ref[...], 0.0)          # bias + ReLU in f32 vregs
    y = lax.dot_general(
        h.astype(w2_ref.dtype), w2_ref[...],
        dimension_numbers=(((1,), (0,)), ((), ())),
        preferred_element_type=jnp.float32)
    o_ref[...] = (y + b2_ref[...]).astype(o_ref.dtype)


def _ff_kernel_htiled(x_ref, w1_ref, b1_ref, w2_ref, b2_ref, o_ref, acc_ref):
    # Hidden dim tiled along the last ("arbitrary") grid axis; f32 accumulator
    # (tm, D) persists across H steps with pl.when init / finalize.
    j = pl.program_id(1)

    @pl.when(j == 0)
    def _init():
        acc_ref[...] = jnp.zeros_like(acc_ref)

    h = lax.dot_general(
        x_ref[...], w1_ref[...],
        dimension_numbers=(((1,), (0,)), ((), ())),
        preferred_element_type=jnp.float32)
    h = jnp.maximum(h + b1_ref[...], 0.0)
    acc_ref[...] += lax.dot_general(
        h.astype(w2_ref.dtype), w2_ref[...],
        dimension_numbers=(((1,), (0,)), ((), ())),
        preferred_element_type=jnp.float32)

    @pl.when(j == pl.num_programs(1) - 1)
    def _finalize():
        o_ref[...] = (acc_ref[...] + b2_ref[...]).astype(o_ref.dtype)


# --------------------------------------------------------------- wrapper ----

def feed_forward(x, w1, b1, w2, b2, *, tm=512, th=None, compute_dtype=None):
    """Fused feed-forward: returns (W2(relu(W1(x))), 0).

    x:  (..., D)
    w1: (H, D), b1: (H,)   -- PyTorch nn.Linear layout
    w2: (D, H), b2: (D,)
    tm: target row tile.  th: force an H tile (multiple of 128) -> H-tiled
        accumulator path; th=None picks automatically (resident weights when
        they fit VMEM).
    compute_dtype: e.g. jnp.bfloat16 for MXU peak / half the weight HBM bytes;
        accumulation, bias and ReLU stay f32.
    """
    orig_shape = x.shape
    D = orig_shape[-1]
    H = w1.shape[0]
    out_dtype = x.dtype

    if compute_dtype is not None:
        x = x.astype(compute_dtype)
        w1 = w1.astype(compute_dtype)
        w2 = w2.astype(compute_dtype)

    x2 = x.reshape(-1, D)
    M = x2.shape[0]

    xsz = jnp.dtype(x2.dtype).itemsize
    wsz = jnp.dtype(w1.dtype).itemsize
    osz = jnp.dtype(out_dtype).itemsize
    sub = 16 if xsz < 4 else 8            # packed sublane for sub-32-bit dtypes

    vmem_cap = _vmem_capacity_bytes()
    vmem_budget = int(0.70 * vmem_cap)    # leave headroom for compiler scratch

    # ---- row tile: large for weight reuse, but >=2 tiles so both v7x TCs work
    tm_req = max(_round_up(tm, sub), sub)
    if M > tm_req:
        tm_eff = tm_req
    elif M > sub:
        tm_eff = max(_round_up((M + 1) // 2, sub), sub)   # split -> 2 row tiles
    else:
        tm_eff = sub

    # ---- resident-weights decision ------------------------------------------
    def _resident_bytes(t):
        return (4 * D * H * wsz             # W1^T + W2^T, double-buffered
                + 2 * (H + D) * 4           # biases (f32)
                + 2 * t * D * (xsz + osz)   # x / out tiles, double-buffered
                + t * H * 6                 # (tm,H) intermediate + cast copy
                + t * D * 4)                # slack

    forced_tiled = (th is not None) and (_round_up(th, 128) < H)
    resident = (not forced_tiled) and (_resident_bytes(tm_eff) <= vmem_budget)
    if (not forced_tiled) and (not resident):
        # shrink the row tile before giving up on resident weights
        t = tm_eff
        while t > 128 and _resident_bytes(t) > vmem_budget:
            t = max(_round_up(t // 2, sub), sub)
        if _resident_bytes(t) <= vmem_budget:
            resident, tm_eff = True, t

    # One transpose per call in HBM (amortized over all row tiles); both MXU
    # matmuls then contract the RHS major dim -> no per-step XLU transposes.
    w1t = w1.T                                  # (D, H)
    w2t = w2.T                                  # (H, D)
    b1r = b1.reshape(1, H).astype(jnp.float32)
    b2r = b2.reshape(1, D).astype(jnp.float32)

    if resident:
        Mp = _round_up(M, tm_eff)
        if Mp != M:
            x2 = jnp.pad(x2, ((0, Mp - M), (0, 0)))
        grid = (Mp // tm_eff,)
        est = _resident_bytes(tm_eff)
        vmem_limit = int(min(vmem_cap, max(32 << 20, int(1.3 * est))))

        out = pl.pallas_call(
            _ff_kernel_resident,
            out_shape=jax.ShapeDtypeStruct((Mp, D), out_dtype),
            grid_spec=pltpu.PrefetchScalarGridSpec(
                num_scalar_prefetch=0,
                grid=grid,
                in_specs=[
                    pl.BlockSpec((tm_eff, D), lambda i: (i, 0)),  # x row tile
                    pl.BlockSpec((D, H), lambda i: (0, 0)),       # W1^T (resident)
                    pl.BlockSpec((1, H), lambda i: (0, 0)),       # b1
                    pl.BlockSpec((H, D), lambda i: (0, 0)),       # W2^T (resident)
                    pl.BlockSpec((1, D), lambda i: (0, 0)),       # b2
                ],
                out_specs=pl.BlockSpec((tm_eff, D), lambda i: (i, 0)),
            ),
            compiler_params=pltpu.CompilerParams(
                dimension_semantics=("parallel",),
                vmem_limit_bytes=vmem_limit,
            ),
        )(x2, w1t, b1r, w2t, b2r)

        out = out[:M].reshape(orig_shape)
        return out, 0                    # module returns (output, 0)

    # ---------------------------- H-tiled path -------------------------------
    if th is not None:
        th_eff = max(_round_up(th, 128), 128)
    else:
        # largest th (multiple of 128) whose double-buffered tiles fit budget
        th_cap = 0
        while True:
            fixed = 2 * tm_eff * D * (xsz + osz) + tm_eff * D * 4 + 2 * D * 4
            per_h = 4 * D * wsz + 8 + 6 * tm_eff
            avail = vmem_budget - fixed
            th_cap = avail // per_h if avail > 0 else 0
            if th_cap >= 128 or tm_eff <= max(sub, 128):
                break
            tm_eff = max(_round_up(tm_eff // 2, sub), sub)
        th_cap = max(128, (th_cap // 128) * 128)
        th_cap = min(th_cap, _round_up(H, 128))
        # prefer a tile that divides H -> no per-call weight padding in HBM
        th_eff = None
        t = th_cap
        while t >= 128:
            if H % t == 0:
                th_eff = t
                break
            t -= 128
        if th_eff is None:
            th_eff = th_cap

    Hp = _round_up(H, th_eff)
    Mp = _round_up(M, tm_eff)
    if Mp != M:
        x2 = jnp.pad(x2, ((0, Mp - M), (0, 0)))
    if Hp != H:
        w1t = jnp.pad(w1t, ((0, 0), (0, Hp - H)))
        w2t = jnp.pad(w2t, ((0, Hp - H), (0, 0)))
        b1r = jnp.pad(b1r, ((0, 0), (0, Hp - H)))

    grid = (Mp // tm_eff, Hp // th_eff)   # rows parallel, hidden reduction last
    est = (2 * tm_eff * D * (xsz + osz) + tm_eff * D * 4
           + 4 * D * th_eff * wsz + 2 * (th_eff + D) * 4 + 6 * tm_eff * th_eff)
    vmem_limit = int(min(vmem_cap, max(32 << 20, int(1.3 * est))))

    out = pl.pallas_call(
        _ff_kernel_htiled,
        out_shape=jax.ShapeDtypeStruct((Mp, D), out_dtype),
        grid_spec=pltpu.PrefetchScalarGridSpec(
            num_scalar_prefetch=0,
            grid=grid,
            in_specs=[
                pl.BlockSpec((tm_eff, D), lambda i, j: (i, 0)),   # x row tile
                pl.BlockSpec((D, th_eff), lambda i, j: (0, j)),   # W1^T hidden tile
                pl.BlockSpec((1, th_eff), lambda i, j: (0, j)),   # b1 hidden tile
                pl.BlockSpec((th_eff, D), lambda i, j: (j, 0)),   # W2^T hidden tile
                pl.BlockSpec((1, D), lambda i, j: (0, 0)),        # b2
            ],
            out_specs=pl.BlockSpec((tm_eff, D), lambda i, j: (i, 0)),
            scratch_shapes=[pltpu.VMEM((tm_eff, D), jnp.float32)],
        ),
        compiler_params=pltpu.CompilerParams(
            dimension_semantics=("parallel", "arbitrary"),
            vmem_limit_bytes=vmem_limit,
        ),
    )(x2, w1t, b1r, w2t, b2r)

    out = out[:M].reshape(orig_shape)
    return out, 0


# ----------------------------------------------------------------- helpers --

def init_params(key, embedding_dim, ff_hidden_dim, dtype=jnp.float32):
    """nn.Linear-style init U(-1/sqrt(fan_in), 1/sqrt(fan_in)), PyTorch layout."""
    k1, k2, k3, k4 = jax.random.split(key, 4)
    bound1 = 1.0 / (embedding_dim ** 0.5)
    bound2 = 1.0 / (ff_hidden_dim ** 0.5)
    w1 = jax.random.uniform(k1, (ff_hidden_dim, embedding_dim), dtype,
                            minval=-bound1, maxval=bound1)
    b1 = jax.random.uniform(k2, (ff_hidden_dim,), dtype,
                            minval=-bound1, maxval=bound1)
    w2 = jax.random.uniform(k3, (embedding_dim, ff_hidden_dim), dtype,
                            minval=-bound2, maxval=bound2)
    b2 = jax.random.uniform(k4, (embedding_dim,), dtype,
                            minval=-bound2, maxval=bound2)
    return w1, b1, w2, b2


def _reference(x, w1, b1, w2, b2):
    with jax.default_matmul_precision("highest"):
        return jnp.maximum(x @ w1.T + b1, 0.0) @ w2.T + b2


if __name__ == "__main__":
    key = jax.random.PRNGKey(0)
    k1, k2, k3, k4 = jax.random.split(key, 4)

    # --- test 1: small module shapes -> resident-weights fast path ----------
    embedding_dim, ff_hidden_dim = 32, 64
    batch, seq = 2, 8
    x = jax.random.normal(k1, (batch, seq, embedding_dim), dtype=jnp.float32)
    w1, b1, w2, b2 = init_params(k2, embedding_dim, ff_hidden_dim)

    out, zero = feed_forward(x, w1, b1, w2, b2)
    out = jax.block_until_ready(out)
    ref = _reference(x, w1, b1, w2, b2)
    assert out.shape == x.shape
    assert zero == 0
    assert jnp.allclose(out, ref, atol=1e-4, rtol=1e-4)

    # --- test 2: forced H-tiling (f32 accumulator path) + ragged-M padding --
    embedding_dim2, ff_hidden_dim2 = 64, 256
    batch2, seq2 = 4, 50              # M = 200 -> padded to the row tile
    x2 = jax.random.normal(k3, (batch2, seq2, embedding_dim2), dtype=jnp.float32)
    w1b, b1b, w2b, b2b = init_params(k4, embedding_dim2, ff_hidden_dim2)

    out2, zero2 = feed_forward(x2, w1b, b1b, w2b, b2b, tm=64, th=128)
    out2 = jax.block_until_ready(out2)
    ref2 = _reference(x2, w1b, b1b, w2b, b2b)
    assert out2.shape == x2.shape
    assert zero2 == 0
    assert jnp.allclose(out2, ref2, atol=1e-4, rtol=1e-4)

    # --- test 3: bf16 compute path (f32 accumulation), loose tolerance ------
    out3, _ = feed_forward(x2, w1b, b1b, w2b, b2b, compute_dtype=jnp.bfloat16)
    out3 = jax.block_until_ready(out3)
    assert out3.shape == x2.shape
    assert jnp.allclose(out3, ref2, atol=5e-2, rtol=5e-2)

    print("KERNEL_OK")
</pallas_src>

<mosaic_0001>
module attributes {stable_mosaic.version = 11 : i64} {
  func.func @_ff_kernel_resident(%arg0: i32, %arg1: memref<8x32xf32, #tpu.memory_space<vmem>>, %arg2: memref<32x64xf32, #tpu.memory_space<vmem>>, %arg3: memref<1x64xf32, #tpu.memory_space<vmem>>, %arg4: memref<64x32xf32, #tpu.memory_space<vmem>>, %arg5: memref<1x32xf32, #tpu.memory_space<vmem>>, %arg6: memref<8x32xf32, #tpu.memory_space<vmem>>) attributes {dimension_semantics = [#tpu.dimension_semantics<parallel>], iteration_bounds = array<i64: 2>, scalar_prefetch = 0 : i64, scratch_operands = 0 : i64, tpu.core_type = #tpu.core_type<tc>, window_params = [{transform_indices = @transform_0, window_bounds = array<i64: 8, 32>}, {pipeline_mode = #tpu.pipeline_mode<synchronous>, transform_indices = @transform_1, window_bounds = array<i64: 32, 64>}, {pipeline_mode = #tpu.pipeline_mode<synchronous>, transform_indices = @transform_2, window_bounds = array<i64: 1, 64>}, {pipeline_mode = #tpu.pipeline_mode<synchronous>, transform_indices = @transform_3, window_bounds = array<i64: 64, 32>}, {pipeline_mode = #tpu.pipeline_mode<synchronous>, transform_indices = @transform_4, window_bounds = array<i64: 1, 32>}, {transform_indices = @transform_5, window_bounds = array<i64: 8, 32>}]} {
    %c0 = arith.constant 0 : index
    %c0_0 = arith.constant 0 : index
    %0 = vector.load %arg1[%c0, %c0_0] : memref<8x32xf32, #tpu.memory_space<vmem>>, vector<8x32xf32>
    %c0_1 = arith.constant 0 : index
    %c0_2 = arith.constant 0 : index
    %1 = vector.load %arg2[%c0_1, %c0_2] : memref<32x64xf32, #tpu.memory_space<vmem>>, vector<32x64xf32>
    %cst = arith.constant dense<0.000000e+00> : vector<8x64xf32>
    %2 = tpu.matmul %0, %1, %cst {dimension_numbers = #tpu.dot_dimension_numbers<[1], [0], [0], [1], [0, 0, 1, 1], [], []>} : vector<8x32xf32>, vector<32x64xf32>, vector<8x64xf32> -> vector<8x64xf32>
    %c0_3 = arith.constant 0 : index
    %c0_4 = arith.constant 0 : index
    %3 = vector.load %arg3[%c0_3, %c0_4] : memref<1x64xf32, #tpu.memory_space<vmem>>, vector<1x64xf32>
    %4 = vector.broadcast %3 : vector<1x64xf32> to vector<8x64xf32>
    %5 = arith.addf %2, %4 : vector<8x64xf32>
    %cst_5 = arith.constant 0.000000e+00 : f32
    %6 = vector.broadcast %cst_5 : f32 to vector<8x64xf32>
    %7 = arith.maximumf %5, %6 : vector<8x64xf32>
    %c0_6 = arith.constant 0 : index
    %c0_7 = arith.constant 0 : index
    %8 = vector.load %arg4[%c0_6, %c0_7] : memref<64x32xf32, #tpu.memory_space<vmem>>, vector<64x32xf32>
    %cst_8 = arith.constant dense<0.000000e+00> : vector<8x32xf32>
    %9 = tpu.matmul %7, %8, %cst_8 {dimension_numbers = #tpu.dot_dimension_numbers<[1], [0], [0], [1], [0, 0, 1, 1], [], []>} : vector<8x64xf32>, vector<64x32xf32>, vector<8x32xf32> -> vector<8x32xf32>
    %c0_9 = arith.constant 0 : index
    %c0_10 = arith.constant 0 : index
    %10 = vector.load %arg5[%c0_9, %c0_10] : memref<1x32xf32, #tpu.memory_space<vmem>>, vector<1x32xf32>
    %11 = vector.broadcast %10 : vector<1x32xf32> to vector<8x32xf32>
    %12 = arith.addf %9, %11 : vector<8x32xf32>
    %c0_11 = arith.constant 0 : index
    %c0_12 = arith.constant 0 : index
    %13 = vector.load %arg6[%c0_11, %c0_12] : memref<8x32xf32, #tpu.memory_space<vmem>>, vector<8x32xf32>
    tpu.vector_store %arg6[%c0_11, %c0_12], %12 {strides = array<i32>} : memref<8x32xf32, #tpu.memory_space<vmem>>, vector<8x32xf32>,
    return
  }
  func.func @transform_0(%arg0: i32) -> (i32, i32) {
    %c0_i32 = arith.constant 0 : i32
    %c0_i32_0 = arith.constant 0 : i32
    return %arg0, %c0_i32 : i32, i32
  }
  func.func @transform_1(%arg0: i32) -> (i32, i32) {
    %c0_i32 = arith.constant 0 : i32
    %c0_i32_0 = arith.constant 0 : i32
    %c0_i32_1 = arith.constant 0 : i32
    return %c0_i32, %c0_i32_0 : i32, i32
  }
  func.func @transform_2(%arg0: i32) -> (i32, i32) {
    %c0_i32 = arith.constant 0 : i32
    %c0_i32_0 = arith.constant 0 : i32
    %c0_i32_1 = arith.constant 0 : i32
    return %c0_i32, %c0_i32_0 : i32, i32
  }
  func.func @transform_3(%arg0: i32) -> (i32, i32) {
    %c0_i32 = arith.constant 0 : i32
    %c0_i32_0 = arith.constant 0 : i32
    %c0_i32_1 = arith.constant 0 : i32
    return %c0_i32, %c0_i32_0 : i32, i32
  }
  func.func @transform_4(%arg0: i32) -> (i32, i32) {
    %c0_i32 = arith.constant 0 : i32
    %c0_i32_0 = arith.constant 0 : i32
    %c0_i32_1 = arith.constant 0 : i32
    return %c0_i32, %c0_i32_0 : i32, i32
  }
  func.func @transform_5(%arg0: i32) -> (i32, i32) {
    %c0_i32 = arith.constant 0 : i32
    %c0_i32_0 = arith.constant 0 : i32
    return %arg0, %c0_i32 : i32, i32
  }
}

</mosaic_0001>

<bundles_post_ra>
// kernel: tpu_custom_call.1
= control target key start
LH: loop header
LB: loop body
LE: loop exit
PB: predicated region body
PF: predicated region fallthrough
CT: control target
= control target key end

     0   :  { %10 = vsyncpa [#allocation3], 0  ;;  %s830_s0 = inlined_call_operand.vmem [shape: f32[16,32], index: 0, kind: input, shape index: {}]   ;;  %s831_s1 = inlined_call_operand.vmem [shape: f32[32,64], index: 1, kind: input, shape index: {}]   ;;  %s832_s2 = inlined_call_operand.vmem [shape: f32[1,64], index: 2, kind: input, shape index: {}]   ;;  %s833_s3 = inlined_call_operand.vmem [shape: f32[64,32], index: 3, kind: input, shape index: {}]   ;;  %s834_s4 = inlined_call_operand.vmem [shape: f32[1,32], index: 4, kind: input, shape index: {}]   ;;  %s835_s5 = inlined_call_operand.hbm [shape: f32[16,32], index: 5, kind: output, shape index: {}]  }
   0x1   :  { %12 = vsyncpa [#allocation3 + $0x1], 0  ;;  %s686_s18 = smov 0   ;;  %s688_s19 = smov 0  }
   0x2   :  { %s690_s20 = smov 0   ;;  %s692_s21 = smov 0  }
   0x3 LB: > { %s707_s22 = sadd.s32 4294967295, %s650_s21   ;;  %s470_s23 = sadd.s32 4294967294, %s650_s21   ;;  %s650_s21 = sphi %s692_s21, %s841_s21   ;;  %s646_s20 = sphi %s690_s20, %s840_s20   ;;  %s642_s19 = sphi %s688_s19, %s839_s19   ;;  %s638_s18 = sphi %s686_s18, %s838_s18  }
   0x4   : > { %s711_s24 = sadd.s32 1, %s650_s21   ;;  %s135_s25 = sadd.s32 1, %s646_s20 }
   0x5   : > { %s132_s26 = ssub.s32 %s650_s21, %s711_s24  ;;  %p145_p0 = scmp.ne.s32.totalorder %s646_s20, %s642_s19 }
   0x6   : > { %p133_p1 = scmp.eq.s32.totalorder %s132_s26, 0  ;;  %p146_p2 = scmp.eq.s32.totalorder %s707_s22, 1 }
   0x7   : > { %p151_p3 = scmp.ne.s32.totalorder %s642_s19, %s638_s18  ;;  %p152_p4 = scmp.eq.s32.totalorder %s470_s23, 1 }
   0x8   : > { %s722_s27 = scalar_select %p133_p1, %s646_s20, %s135_s25  }
   0x9   : > { %p724_p5 = por %p146_p2, %p145_p0  ;;  %p728_p6 = por %p152_p4, %p151_p3 }
   0xa   : > { %p473_p7 = scmp.ge.s32.totalorder %s650_s21, 1  ;;  %p189_p8 = scmp.lt.s32.totalorder %s650_s21, 3 }
   0xc   : > { %p190_p9 = pnand %p473_p7, %p189_p8 }
   0xd   : > { %v221_v0 = vld [vmem:[%s831_s1] sm:$0xff] (!%p190_p9)  ;;  %v222_v1 = vld [vmem:[%s831_s1 + $0x8] sm:$0xff] (!%p190_p9)  ;;  %v223_v2 = vld [vmem:[%s831_s1 + $0x10] sm:$0xff] (!%p190_p9)  ;;  %v652_v3 = vmov (!%p190_p9), 0.0|0.0   ;;  %vm653_vm0 = vmmov (!%p190_p9), 0   ;;  %v654_v6 = vmov (!%p190_p9), 0.0  }
   0xe   : > { %193 = sbr.rel (%p190_p9) target bundleno = 470 (0x1d6), region = 40  ;;  %528 = vmatprep.subr.bf16.mxu0 (!%p190_p9), %v652_v3  ;;  %v529_v4 = vpack.c.bf16 (!%p190_p9), %v222_v1, %v221_v0  ;;  %v224_v5 = vld [vmem:[%s831_s1 + $0x18] sm:$0xff] (!%p190_p9)  ;;  %506 = vmatprep.mubr.msk.f32.mxu0 (!%p190_p9), %vm653_vm0, %v654_v6  ;;  %p216_p10 = scmp.lt.s32.totalorder (!%p190_p9), %s707_s22, 1  ;;  %v307_v7 = vld [vmem:[%s833_s3] sm:$0xff] (!%p190_p9)  ;;  %v308_v8 = vld [vmem:[%s833_s3 + $0x8] sm:$0xff] (!%p190_p9)  ;;  %vm232_vm1 = vcmask (!%p190_p9), 261120  }
   0xf   : > { %534 = vmatprep.subr.bf16.mxu1 (!%p190_p9), %v652_v3  ;;  %v535_v9 = vpack.c.bf16 (!%p190_p9), %v308_v8, %v307_v7  ;;  %v309_v10 = vld [vmem:[%s833_s3 + $0x10] sm:$0xff] (!%p190_p9)  ;;  %v310_v11 = vld [vmem:[%s833_s3 + $0x18] sm:$0xff] (!%p190_p9)  ;;  %525 = vmatprep.mubr.msk.f32.mxu1 (!%p190_p9), %vm653_vm0, %v654_v6  ;;  %v532_v12 = vpack.c.bf16 (!%p190_p9), %v224_v5, %v223_v2  ;;  %v311_v14 = vld [vmem:[%s833_s3 + $0x20] sm:$0xff] (!%p190_p9)  ;;  %vm322_vm2 = vcmask (!%p190_p9), 523264   ;;  %s213_s26 = sand.u32 (!%p190_p9), 1, %s642_s19   ;;  %s481_s8 = sshll.u32 (!%p190_p9), %s707_s22, 7 }
  0x10   : > { %530 = vmatpush3.bf16.msra.mxu0 (!%p190_p9), %v529_v4  ;;  %v538_v13 = vpack.c.bf16 (!%p190_p9), %v310_v11, %v309_v10  ;;  %v312_v15 = vld [vmem:[%s833_s3 + $0x28] sm:$0xff] (!%p190_p9)  ;;  %v313_v18 = vld [vmem:[%s833_s3 + $0x30] sm:$0xff] (!%p190_p9)  ;;  %v314_v19 = vld [vmem:[%s833_s3 + $0x38] sm:$0xff] (!%p190_p9)  ;;  %s398_s14 = scalar_lea.sflag (!%p190_p9), [#allocation3], %s213_s26 }
  0x11   : > { %531 = vmatprep.subr.bf16.mxu0 (!%p190_p9), %v652_v3  ;;  %536 = vmatpush3.bf16.msra.mxu1 (!%p190_p9), %v535_v9  ;;  %v541_v17 = vpack.c.bf16 (!%p190_p9), %v312_v15, %v311_v14  ;;  %v544_v20 = vpack.c.bf16 (!%p190_p9), %v314_v19, %v313_v18  ;;  %v476_v21 = vld [vmem:[%s832_s2] ss:$0 sm:$0xff] (!%p190_p9) }
  0x12   : > { %537 = vmatprep.subr.bf16.mxu1 (!%p190_p9), %v652_v3  ;;  %v478_v26 = vld [vmem:[%s834_s4] ss:$0 sm:$0xff] (!%p190_p9) }
  0x14   : > { %533 = vmatpush3.bf16.msra.mxu0 (!%p190_p9), %v532_v12 }
  0x15   : > { %s217_s30 = scalar_select %p216_p10, %s707_s22, 1  ;;  %539 = vmatpush3.bf16.msra.mxu1 %v538_v13 }
  0x16   : > { %540 = vmatprep.subr.bf16.mxu1 %v652_v3  ;;  %s655_s22 = smov [#allocation2]  }
  0x17   : > { %s475_s6 = sshll.u32 %s217_s30, 3  ;;  %s474_s30 = sshll.u32 %s213_s26, 3 }
  0x18   : > { %s219_s13 = scalar_lea.vmem %s830_s0, %s475_s6  ;;  %s215_s9 = scalar_lea.vmem [#allocation2], %s474_s30 }
  0x19   : > { %v220_v16 = vld [vmem:[%s219_s13] sm:$0xff]  ;;  %542 = vmatpush3.bf16.msra.mxu1 %v541_v17  ;;  %s411_s10 = sshll.u32 %s215_s9, 4  ;;  %s787_s13 = scalar_lea.hbm %s835_s5, %s481_s8  ;;  %s789_s10 = int_to_ptr.vmem [resolvable:$true] %s411_s10 }
  0x1a   : > { %507 = vmatmul.mubr.msk.f32.vlgmr.msra.gmra.mrb[0].mxu0 %vm232_vm1, %v220_v16  ;;  %543 = vmatprep.subr.bf16.mxu1 %v652_v3  ;;  %s588_s15 = scalar_lea.vmem %s789_s10, 128  ;;  %s592_s16 = sshll.u32 %s655_s22, 4  ;;  %s593_s16 = int_to_ptr.vmem [resolvable:$false] %s592_s16 }
  0x1b   : > { %p589_p11 = scmp.ne.s32.totalorder %s789_s10, %s588_s15  ;;  %s594_s17 = scalar_lea.vmem %s593_s16, 256 }
  0x1c   : > { %p595_p0 = scmp.lt.s32.totalorder %s789_s10, %s593_s16  ;;  %p596_p1 = scmp.lt.s32.totalorder %s594_s17, %s588_s15 }
  0x1d   : > { %545 = vmatpush3.bf16.msra.mxu1 %v544_v20  ;;  %p590_p12 = pnand %p589_p11, %p724_p5 }
  0x1e   : > { %p597_p2 = por %p596_p1, %p595_p0 }
  0x1f   : > { %p591_p13 = pneg %p590_p12 }
  0x21   : > { %p598_p3 = pnand %p597_p2, %p591_p13 }
  0xed   : > { %v302_v22 = vpop.f32.mrb[0].mxu0 }
  0xee   : > { %v303_v23 = vadd.f32 %v476_v21, %v302_v22  ;;  %v508_v24 = vpop.f32.mrb[1].mxu0 }
  0xf0   : > { %v306_v25 = vmax.f32 %v303_v23, 0.0 }
  0xf2   : > { %526 = vmatmul.mubr.msk.f32.vlgmr.msra.gmra.mrb[0].mxu1 %vm322_vm2, %v306_v25 }
 0x1c5   : > { %v392_v27 = vpop.f32.mrb[0].mxu1 }
 0x1c6   : > { %v393_v28 = vadd.f32 %v478_v26, %v392_v27  ;;  %v527_v29 = vpop.f32.mrb[1].mxu1 }
 0x1c8   : > { %396 = vst.msk [vmem:[%s215_s9] sm:$0xff] %vm232_vm1, %v393_v28 }
 0x1c9   : > { %601 = shalt.err (!%p598_p3)
}
 0x1ca   : > { %s602_s23 = scalar_lea.hbm %s787_s13, 128  ;;  %s606_s30 = scalar_lea.hbm %s835_s5, 256 }
 0x1cb   : > { %p603_p4 = scmp.ne.s32.totalorder %s787_s13, %s602_s23  ;;  %p607_p9 = scmp.lt.u32.totalorder %s787_s13, %s835_s5 }
 0x1cc   : > { %p608_p10 = scmp.lt.u32.totalorder %s606_s30, %s602_s23  ;;  %p610_p12 = scmp.lt.u32.totalorder %s602_s23, %s787_s13 }
 0x1cd   : > { %p604_p7 = pnand %p603_p4, %p724_p5 }
 0x1ce   : > { %p609_p11 = por %p608_p10, %p607_p9 }
 0x1cf   : > { %p605_p8 = pneg %p604_p7 }
 0x1d0   : > { %p611_p13 = por %p610_p12, %p609_p11 }
 0x1d2   : > { %p612_p0 = pnand %p611_p13, %p605_p8 }
 0x1d4   : > { %615 = shalt.err (!%p612_p0)
}
 0x1d5   : > { %546 = dma.vmem_to_hbm [thread:$0]  (%p724_p5), %s789_s10, 128, %s787_s13, %s398_s14  }
 0x1d6 PF: > { %p552_p1 = scmp.ge.s32.totalorder %s650_s21, 2  ;;  %s423_s8 = sand.u32 1, %s638_s18  }
 0x1d7   : > { %s424_s9 = scalar_lea.sflag [#allocation3], %s423_s8 }
 0x1d8   : > { %p549_p2 = pnand %p552_p1, %p728_p6 }
 0x1da   : > { %633 = dma.done.wait (!%p549_p2), %s424_s9, 128  }
 0x1db   : > { %635 = vsyncadd (!%p549_p2), %s424_s9, 4294967168  ;;  %p15_p3 = scmp.ge.s32.totalorder %s711_s24, 4   ;;  %s838_s18 = smov %s642_s19 }
 0x1dc   : > { %s839_s19 = smov %s646_s20  ;;  %s840_s20 = smov %s722_s27 }
 0x1dd   : > { %s841_s21 = smov %s711_s24  ;;  %17 = sbr.rel (!%p15_p3) target bundleno = 3 (0x3), region = 75 }
 0x1e4   :  { %429 = vsyncpa [#allocation3], 1 }
 0x1e5   :  { %431 = vsyncpa [#allocation3 + $0x1], 1 }

</bundles_post_ra>
